<compile_context>
chip_gen: v7x
topology: tpu7x:2x2x1
jax: 0.10.0
libtpu: 0.0.40
codegen_flags: <defaults>
</compile_context>

<pallas_src>
import jax
import jax.numpy as jnp
from jax.experimental import pallas as pl
from jax.experimental.pallas import tpu as pltpu

MARGIN = 0.3
BN_EPS = 1e-5
NORM_EPS = 1e-12


def _spatial_memory_kernel(q_ref, key_ref, mval_ref, gamma_ref, beta_ref,
                           valnc_ref, pool_ref, pooled_ref, loss_ref):
    q = q_ref[...]              # (N, C) f32, row-major flatten of NCHW query
    key = key_ref[...]          # (M, C) f32
    mv = mval_ref[...]          # (M, C) f32

    # F.normalize(query_rs, dim=1): per-row L2 over features (EUP rsqrt).
    q_ssq = jnp.sum(q * q, axis=1, keepdims=True)                        # (N, 1)
    qn = q * jax.lax.rsqrt(jnp.maximum(q_ssq, NORM_EPS * NORM_EPS))

    # F.normalize(key.t(), dim=1): each key COLUMN (per-feature, across memory
    # slots) normalized -- quirk of the original code, reproduced faithfully.
    k_ssq = jnp.sum(key * key, axis=0, keepdims=True)                    # (1, C)
    kn = key * jax.lax.rsqrt(jnp.maximum(k_ssq, NORM_EPS * NORM_EPS))    # (M, C)

    # similarity = qn @ kn.T -> (N, M); bf16 operands, f32 accumulation (MXU).
    sim = jax.lax.dot_general(
        qn.astype(jnp.bfloat16), kn.astype(jnp.bfloat16),
        (((1,), (1,)), ((), ())),
        preferred_element_type=jnp.float32)

    # softmax over the memory axis (exp on EUP, approx reciprocal on EUP).
    m = jnp.max(sim, axis=1, keepdims=True)
    e = jnp.exp(sim - m)
    r_att = e * pl.reciprocal(jnp.sum(e, axis=1, keepdims=True), approx=True)

    # read = r_att @ val -> (N, C); bf16 operands, f32 accumulation (MXU).
    read = jnp.dot(r_att.astype(jnp.bfloat16), mv.astype(jnp.bfloat16),
                   preferred_element_type=jnp.float32)

    # BatchNorm1d, training-mode biased batch statistics (running stats are a
    # training side effect and are not produced here).
    mu = jnp.mean(read, axis=0, keepdims=True)
    var = jnp.mean(jnp.square(read - mu), axis=0, keepdims=True)
    read_bn = ((read - mu) * jax.lax.rsqrt(var + BN_EPS)
               * gamma_ref[...] + beta_ref[...])                         # (N, C)

    # Fused epilogue: out = avgpool(val - read_bn.reshape(BS,C,H,W)).
    # valnc has the same row-major flat layout as val, so D's flat buffer is
    # exactly (val - read_bn.reshape(...)).  With C % S == 0 each pooled
    # element is the mean of S adjacent columns of one row of D, i.e. D @ pool.
    diff = valnc_ref[...] - read_bn                                      # (N, C)
    pooled_ref[...] = jnp.dot(diff, pool_ref[...],
                              preferred_element_type=jnp.float32)        # (N, C//S)

    # loss: topk(k=N, dim=0)[0][-1] == per-column min, [0][0] == per-column max
    col_min = jnp.min(r_att, axis=0, keepdims=True)                      # (1, M)
    col_max = jnp.max(r_att, axis=0, keepdims=True)                      # (1, M)
    dist = col_min - col_max + MARGIN
    loss_ref[0, 0] = jnp.mean(jnp.maximum(dist, 0.0))                    # SMEM scalar


def spatial_memory_forward(query, val, key_param, val_param, bn_gamma, bn_beta):
    BS, C, H, W = query.shape
    S = H * W
    N = BS * S
    M = key_param.shape[0]

    if C % S != 0:
        # TODO(synk): general H*W (not dividing feat_dim) needs a banded
        # pooling matrix or a separate pooling pass.
        raise NotImplementedError("fused pooling path requires feat_dim % (H*W) == 0")
    CS = C // S

    query_rs = query.reshape(N, C)    # row-major, same as torch .reshape(-1, C)
    val_nc = val.reshape(N, C)        # same flat buffer as (BS, C, H, W)
    gamma2d = bn_gamma.reshape(1, C).astype(jnp.float32)
    beta2d = bn_beta.reshape(1, C).astype(jnp.float32)

    # Constant pooling matrix: mean of each group of S adjacent feature columns.
    col = jnp.arange(C, dtype=jnp.int32)
    grp = jnp.arange(CS, dtype=jnp.int32)
    pool_mat = ((col[:, None] // S) == grp[None, :]).astype(jnp.float32) / S  # (C, CS)

    pooled, loss = pl.pallas_call(
        _spatial_memory_kernel,
        grid=(1,),
        in_specs=[
            pl.BlockSpec((N, C), lambda i: (0, 0)),     # query_rs
            pl.BlockSpec((M, C), lambda i: (0, 0)),     # key
            pl.BlockSpec((M, C), lambda i: (0, 0)),     # val (memory)
            pl.BlockSpec((1, C), lambda i: (0, 0)),     # bn gamma
            pl.BlockSpec((1, C), lambda i: (0, 0)),     # bn beta
            pl.BlockSpec((N, C), lambda i: (0, 0)),     # input val as (N, C)
            pl.BlockSpec((C, CS), lambda i: (0, 0)),    # pooling matrix
        ],
        out_specs=(
            pl.BlockSpec((N, CS), lambda i: (0, 0)),
            pl.BlockSpec(memory_space=pltpu.MemorySpace.SMEM),
        ),
        out_shape=(
            jax.ShapeDtypeStruct((N, CS), jnp.float32),
            jax.ShapeDtypeStruct((1, 1), jnp.float32),
        ),
        compiler_params=pltpu.CompilerParams(
            dimension_semantics=("arbitrary",)),
    )(query_rs, key_param, val_param, gamma2d, beta2d, val_nc, pool_mat)

    # (N, C//S) -> (BS, C): pure row-major reinterpretation of the tiny pooled
    # result; out[b, c] = pooled[b*S + c // CS, c % CS].
    out = pooled.reshape(BS, C)
    return {'out': out, 'loss': {'mem_trip': loss[0, 0]}}


def _reference(query, val, key_param, val_param, bn_gamma, bn_beta):
    """Pure-JAX f32 reference mirroring the torch forward (incl. its quirks)."""
    BS, C, H, W = query.shape
    q = query.reshape(-1, C)
    qn = q / jnp.maximum(jnp.linalg.norm(q, axis=1, keepdims=True), NORM_EPS)
    kt = key_param.T
    ktn = kt / jnp.maximum(jnp.linalg.norm(kt, axis=1, keepdims=True), NORM_EPS)
    sim = qn @ ktn
    r_att = jax.nn.softmax(sim, axis=1)
    read = r_att @ val_param
    mu = read.mean(0)
    var = ((read - mu) ** 2).mean(0)
    read_bn = (read - mu) / jnp.sqrt(var + BN_EPS) * bn_gamma + bn_beta
    out = (val - read_bn.reshape(BS, C, H, W)).mean(axis=(2, 3))
    dist = r_att.min(0) - r_att.max(0) + MARGIN
    return out, jnp.maximum(dist, 0.0).mean()


if __name__ == "__main__":
    BS, C, H, W = 2, 32, 4, 4      # feat_dim = 32, 4x4 spatial  (C % (H*W) == 0)
    MEM = 16                       # mem_size = 16

    root = jax.random.PRNGKey(0)
    k1, k2, k3, k4, k5, k6 = jax.random.split(root, 6)

    query = jax.random.normal(k1, (BS, C, H, W), dtype=jnp.float32)
    val_in = jax.random.normal(k2, (BS, C, H, W), dtype=jnp.float32)
    key_param = jax.random.normal(k3, (MEM, C), dtype=jnp.float32)   # self.key
    val_param = jax.random.normal(k4, (MEM, C), dtype=jnp.float32)   # self.val

    # Case 1: module's actual init (bn.weight = bn.bias = 0) -> read_bn == 0
    # exactly, so the fused subtract+pool path is checked tightly in f32.
    gamma0 = jnp.zeros((C,), jnp.float32)
    beta0 = jnp.zeros((C,), jnp.float32)
    res0 = spatial_memory_forward(query, val_in, key_param, val_param, gamma0, beta0)
    jax.block_until_ready(res0)
    ref_out0, ref_loss0 = _reference(query, val_in, key_param, val_param, gamma0, beta0)
    assert res0['out'].shape == (BS, C)
    assert jnp.allclose(res0['out'], ref_out0, atol=1e-5, rtol=1e-5)
    assert jnp.allclose(res0['loss']['mem_trip'], ref_loss0, atol=1e-2, rtol=1e-2)

    # Case 2: nonzero BN affine params -> exercises normalize/softmax/matmul/BN
    # end to end (per review's correctness concern).  Looser tolerance accounts
    # for bf16 MXU operands + the EUP approx reciprocal in the kernel.
    gamma1 = 0.5 + 0.1 * jax.random.normal(k5, (C,), dtype=jnp.float32)
    beta1 = 0.1 * jax.random.normal(k6, (C,), dtype=jnp.float32)
    res1 = spatial_memory_forward(query, val_in, key_param, val_param, gamma1, beta1)
    jax.block_until_ready(res1)
    ref_out1, ref_loss1 = _reference(query, val_in, key_param, val_param, gamma1, beta1)
    assert res1['out'].shape == (BS, C)
    assert jnp.allclose(res1['out'], ref_out1, atol=5e-2, rtol=5e-2)
    assert jnp.allclose(res1['loss']['mem_trip'], ref_loss1, atol=1e-2, rtol=1e-2)

    print("KERNEL_OK")
</pallas_src>

<mosaic_0001>
module attributes {stable_mosaic.version = 11 : i64} {
  func.func @_spatial_memory_kernel(%arg0: i32, %arg1: memref<32x32xf32, #tpu.memory_space<vmem>>, %arg2: memref<16x32xf32, #tpu.memory_space<vmem>>, %arg3: memref<16x32xf32, #tpu.memory_space<vmem>>, %arg4: memref<1x32xf32, #tpu.memory_space<vmem>>, %arg5: memref<1x32xf32, #tpu.memory_space<vmem>>, %arg6: memref<32x32xf32, #tpu.memory_space<vmem>>, %arg7: memref<32x2xf32, #tpu.memory_space<vmem>>, %arg8: memref<32x2xf32, #tpu.memory_space<vmem>>, %arg9: memref<1x1xf32, #tpu.memory_space<smem>>) attributes {dimension_semantics = [#tpu.dimension_semantics<arbitrary>], iteration_bounds = array<i64: 1>, scalar_prefetch = 0 : i64, scratch_operands = 0 : i64, tpu.core_type = #tpu.core_type<tc>, window_params = [{pipeline_mode = #tpu.pipeline_mode<synchronous>, transform_indices = @transform_0, window_bounds = array<i64: 32, 32>}, {pipeline_mode = #tpu.pipeline_mode<synchronous>, transform_indices = @transform_1, window_bounds = array<i64: 16, 32>}, {pipeline_mode = #tpu.pipeline_mode<synchronous>, transform_indices = @transform_2, window_bounds = array<i64: 16, 32>}, {pipeline_mode = #tpu.pipeline_mode<synchronous>, transform_indices = @transform_3, window_bounds = array<i64: 1, 32>}, {pipeline_mode = #tpu.pipeline_mode<synchronous>, transform_indices = @transform_4, window_bounds = array<i64: 1, 32>}, {pipeline_mode = #tpu.pipeline_mode<synchronous>, transform_indices = @transform_5, window_bounds = array<i64: 32, 32>}, {pipeline_mode = #tpu.pipeline_mode<synchronous>, transform_indices = @transform_6, window_bounds = array<i64: 32, 2>}, {pipeline_mode = #tpu.pipeline_mode<synchronous>, transform_indices = @transform_7, window_bounds = array<i64: 32, 2>}, {transform_indices = @transform_8, window_bounds = array<i64: 1, 1>}]} {
    %c0 = arith.constant 0 : index
    %c0_0 = arith.constant 0 : index
    %0 = vector.load %arg1[%c0, %c0_0] : memref<32x32xf32, #tpu.memory_space<vmem>>, vector<32x32xf32>
    %c0_1 = arith.constant 0 : index
    %c0_2 = arith.constant 0 : index
    %1 = vector.load %arg2[%c0_1, %c0_2] : memref<16x32xf32, #tpu.memory_space<vmem>>, vector<16x32xf32>
    %c0_3 = arith.constant 0 : index
    %c0_4 = arith.constant 0 : index
    %2 = vector.load %arg3[%c0_3, %c0_4] : memref<16x32xf32, #tpu.memory_space<vmem>>, vector<16x32xf32>
    %3 = arith.mulf %0, %0 : vector<32x32xf32>
    %cst = arith.constant dense<0.000000e+00> : vector<32xf32>
    %4 = vector.multi_reduction <add>, %3, %cst [1] : vector<32x32xf32> to vector<32xf32>
    %5 = vector.shape_cast %4 : vector<32xf32> to vector<32x1xf32>
    %cst_5 = arith.constant 1.000000e-24 : f32
    %6 = vector.broadcast %cst_5 : f32 to vector<32x1xf32>
    %7 = arith.maximumf %5, %6 : vector<32x1xf32>
    %8 = math.rsqrt %7 : vector<32x1xf32>
    %9 = vector.broadcast %8 : vector<32x1xf32> to vector<32x32xf32>
    %10 = arith.mulf %0, %9 : vector<32x32xf32>
    %11 = arith.mulf %1, %1 : vector<16x32xf32>
    %cst_6 = arith.constant dense<0.000000e+00> : vector<32xf32>
    %12 = vector.multi_reduction <add>, %11, %cst_6 [0] : vector<16x32xf32> to vector<32xf32>
    %13 = vector.shape_cast %12 : vector<32xf32> to vector<1x32xf32>
    %cst_7 = arith.constant 1.000000e-24 : f32
    %14 = vector.broadcast %cst_7 : f32 to vector<1x32xf32>
    %15 = arith.maximumf %13, %14 : vector<1x32xf32>
    %16 = math.rsqrt %15 : vector<1x32xf32>
    %17 = vector.broadcast %16 : vector<1x32xf32> to vector<16x32xf32>
    %18 = arith.mulf %1, %17 : vector<16x32xf32>
    %19 = arith.truncf %10 : vector<32x32xf32> to vector<32x32xbf16>
    %20 = arith.truncf %18 : vector<16x32xf32> to vector<16x32xbf16>
    %cst_8 = arith.constant dense<0.000000e+00> : vector<32x16xf32>
    %21 = tpu.matmul %19, %20, %cst_8 {dimension_numbers = #tpu.dot_dimension_numbers<[1], [1], [0], [0], [0, 0, 1, 0], [], []>} : vector<32x32xbf16>, vector<16x32xbf16>, vector<32x16xf32> -> vector<32x16xf32>
    %cst_9 = arith.constant dense<0xFF800000> : vector<32xf32>
    %22 = vector.multi_reduction <maximumf>, %21, %cst_9 [1] : vector<32x16xf32> to vector<32xf32>
    %23 = vector.shape_cast %22 : vector<32xf32> to vector<32x1xf32>
    %24 = vector.broadcast %23 : vector<32x1xf32> to vector<32x16xf32>
    %25 = arith.subf %21, %24 : vector<32x16xf32>
    %26 = math.exp %25 : vector<32x16xf32>
    %cst_10 = arith.constant dense<0.000000e+00> : vector<32xf32>
    %27 = vector.multi_reduction <add>, %26, %cst_10 [1] : vector<32x16xf32> to vector<32xf32>
    %28 = vector.shape_cast %27 : vector<32xf32> to vector<32x1xf32>
    %29 = tpu.reciprocal %28 {approx = true} : vector<32x1xf32> -> vector<32x1xf32>
    %30 = vector.broadcast %29 : vector<32x1xf32> to vector<32x16xf32>
    %31 = arith.mulf %26, %30 : vector<32x16xf32>
    %32 = arith.truncf %31 : vector<32x16xf32> to vector<32x16xbf16>
    %33 = arith.truncf %2 : vector<16x32xf32> to vector<16x32xbf16>
    %cst_11 = arith.constant dense<0.000000e+00> : vector<32x32xf32>
    %34 = tpu.matmul %32, %33, %cst_11 {dimension_numbers = #tpu.dot_dimension_numbers<[1], [0], [0], [1], [0, 0, 1, 1], [], []>} : vector<32x16xbf16>, vector<16x32xbf16>, vector<32x32xf32> -> vector<32x32xf32>
    %cst_12 = arith.constant dense<0.000000e+00> : vector<32xf32>
    %35 = vector.multi_reduction <add>, %34, %cst_12 [0] : vector<32x32xf32> to vector<32xf32>
    %36 = vector.shape_cast %35 : vector<32xf32> to vector<1x32xf32>
    %cst_13 = arith.constant 3.200000e+01 : f32
    %37 = vector.broadcast %cst_13 : f32 to vector<1x32xf32>
    %38 = arith.divf %36, %37 : vector<1x32xf32>
    %39 = vector.broadcast %38 : vector<1x32xf32> to vector<32x32xf32>
    %40 = arith.subf %34, %39 : vector<32x32xf32>
    %41 = arith.mulf %40, %40 : vector<32x32xf32>
    %cst_14 = arith.constant dense<0.000000e+00> : vector<32xf32>
    %42 = vector.multi_reduction <add>, %41, %cst_14 [0] : vector<32x32xf32> to vector<32xf32>
    %43 = vector.shape_cast %42 : vector<32xf32> to vector<1x32xf32>
    %cst_15 = arith.constant 3.200000e+01 : f32
    %44 = vector.broadcast %cst_15 : f32 to vector<1x32xf32>
    %45 = arith.divf %43, %44 : vector<1x32xf32>
    %46 = vector.broadcast %38 : vector<1x32xf32> to vector<32x32xf32>
    %47 = arith.subf %34, %46 : vector<32x32xf32>
    %cst_16 = arith.constant 9.99999974E-6 : f32
    %48 = vector.broadcast %cst_16 : f32 to vector<1x32xf32>
    %49 = arith.addf %45, %48 : vector<1x32xf32>
    %50 = math.rsqrt %49 : vector<1x32xf32>
    %51 = vector.broadcast %50 : vector<1x32xf32> to vector<32x32xf32>
    %52 = arith.mulf %47, %51 : vector<32x32xf32>
    %c0_17 = arith.constant 0 : index
    %c0_18 = arith.constant 0 : index
    %53 = vector.load %arg4[%c0_17, %c0_18] : memref<1x32xf32, #tpu.memory_space<vmem>>, vector<1x32xf32>
    %54 = vector.broadcast %53 : vector<1x32xf32> to vector<32x32xf32>
    %55 = arith.mulf %52, %54 : vector<32x32xf32>
    %c0_19 = arith.constant 0 : index
    %c0_20 = arith.constant 0 : index
    %56 = vector.load %arg5[%c0_19, %c0_20] : memref<1x32xf32, #tpu.memory_space<vmem>>, vector<1x32xf32>
    %57 = vector.broadcast %56 : vector<1x32xf32> to vector<32x32xf32>
    %58 = arith.addf %55, %57 : vector<32x32xf32>
    %c0_21 = arith.constant 0 : index
    %c0_22 = arith.constant 0 : index
    %59 = vector.load %arg6[%c0_21, %c0_22] : memref<32x32xf32, #tpu.memory_space<vmem>>, vector<32x32xf32>
    %60 = arith.subf %59, %58 : vector<32x32xf32>
    %c0_23 = arith.constant 0 : index
    %c0_24 = arith.constant 0 : index
    %61 = vector.load %arg7[%c0_23, %c0_24] : memref<32x2xf32, #tpu.memory_space<vmem>>, vector<32x2xf32>
    %cst_25 = arith.constant dense<0.000000e+00> : vector<32x2xf32>
    %62 = tpu.matmul %60, %61, %cst_25 {dimension_numbers = #tpu.dot_dimension_numbers<[1], [0], [0], [1], [0, 0, 1, 1], [], []>} : vector<32x32xf32>, vector<32x2xf32>, vector<32x2xf32> -> vector<32x2xf32>
    %c0_26 = arith.constant 0 : index
    %c0_27 = arith.constant 0 : index
    %63 = vector.load %arg8[%c0_26, %c0_27] : memref<32x2xf32, #tpu.memory_space<vmem>>, vector<32x2xf32>
    tpu.vector_store %arg8[%c0_26, %c0_27], %62 {strides = array<i32>} : memref<32x2xf32, #tpu.memory_space<vmem>>, vector<32x2xf32>,
    %cst_28 = arith.constant dense<0x7F800000> : vector<16xf32>
    %64 = vector.multi_reduction <minimumf>, %31, %cst_28 [0] : vector<32x16xf32> to vector<16xf32>
    %65 = vector.shape_cast %64 : vector<16xf32> to vector<1x16xf32>
    %cst_29 = arith.constant dense<0xFF800000> : vector<16xf32>
    %66 = vector.multi_reduction <maximumf>, %31, %cst_29 [0] : vector<32x16xf32> to vector<16xf32>
    %67 = vector.shape_cast %66 : vector<16xf32> to vector<1x16xf32>
    %68 = arith.subf %65, %67 : vector<1x16xf32>
    %cst_30 = arith.constant 3.000000e-01 : f32
    %69 = vector.broadcast %cst_30 : f32 to vector<1x16xf32>
    %70 = arith.addf %68, %69 : vector<1x16xf32>
    %cst_31 = arith.constant 0.000000e+00 : f32
    %71 = vector.broadcast %cst_31 : f32 to vector<1x16xf32>
    %72 = arith.maximumf %70, %71 : vector<1x16xf32>
    %73 = vector.shape_cast %72 : vector<1x16xf32> to vector<1x1x16xf32>
    %cst_32 = arith.constant dense<0.000000e+00> : vector<1xf32>
    %74 = vector.multi_reduction <add>, %73, %cst_32 [1, 2] : vector<1x1x16xf32> to vector<1xf32>
    %75 = vector.shape_cast %74 : vector<1xf32> to vector<1x1x1xf32>
    %76 = vector.extract %75[0, 0, 0] : f32 from vector<1x1x1xf32>
    %cst_33 = arith.constant 1.600000e+01 : f32
    %77 = arith.divf %76, %cst_33 : f32
    %c0_34 = arith.constant 0 : index
    %c0_35 = arith.constant 0 : index
    %78 = memref.load %arg9[%c0_34, %c0_35] : memref<1x1xf32, #tpu.memory_space<smem>>
    memref.store %77, %arg9[%c0_34, %c0_35] : memref<1x1xf32, #tpu.memory_space<smem>>
    return
  }
  func.func @transform_0(%arg0: i32) -> (i32, i32) {
    %c0_i32 = arith.constant 0 : i32
    %c0_i32_0 = arith.constant 0 : i32
    %c0_i32_1 = arith.constant 0 : i32
    return %c0_i32, %c0_i32_0 : i32, i32
  }
  func.func @transform_1(%arg0: i32) -> (i32, i32) {
    %c0_i32 = arith.constant 0 : i32
    %c0_i32_0 = arith.constant 0 : i32
    %c0_i32_1 = arith.constant 0 : i32
    return %c0_i32, %c0_i32_0 : i32, i32
  }
  func.func @transform_2(%arg0: i32) -> (i32, i32) {
    %c0_i32 = arith.constant 0 : i32
    %c0_i32_0 = arith.constant 0 : i32
    %c0_i32_1 = arith.constant 0 : i32
    return %c0_i32, %c0_i32_0 : i32, i32
  }
  func.func @transform_3(%arg0: i32) -> (i32, i32) {
    %c0_i32 = arith.constant 0 : i32
    %c0_i32_0 = arith.constant 0 : i32
    %c0_i32_1 = arith.constant 0 : i32
    return %c0_i32, %c0_i32_0 : i32, i32
  }
  func.func @transform_4(%arg0: i32) -> (i32, i32) {
    %c0_i32 = arith.constant 0 : i32
    %c0_i32_0 = arith.constant 0 : i32
    %c0_i32_1 = arith.constant 0 : i32
    return %c0_i32, %c0_i32_0 : i32, i32
  }
  func.func @transform_5(%arg0: i32) -> (i32, i32) {
    %c0_i32 = arith.constant 0 : i32
    %c0_i32_0 = arith.constant 0 : i32
    %c0_i32_1 = arith.constant 0 : i32
    return %c0_i32, %c0_i32_0 : i32, i32
  }
  func.func @transform_6(%arg0: i32) -> (i32, i32) {
    %c0_i32 = arith.constant 0 : i32
    %c0_i32_0 = arith.constant 0 : i32
    %c0_i32_1 = arith.constant 0 : i32
    return %c0_i32, %c0_i32_0 : i32, i32
  }
  func.func @transform_7(%arg0: i32) -> (i32, i32) {
    %c0_i32 = arith.constant 0 : i32
    %c0_i32_0 = arith.constant 0 : i32
    %c0_i32_1 = arith.constant 0 : i32
    return %c0_i32, %c0_i32_0 : i32, i32
  }
  func.func @transform_8(%arg0: i32) -> (i32, i32) {
    %c0_i32 = arith.constant 0 : i32
    %c0_i32_0 = arith.constant 0 : i32
    %c0_i32_1 = arith.constant 0 : i32
    return %c0_i32, %c0_i32_0 : i32, i32
  }
}

</mosaic_0001>

<bundles_post_ra>
// kernel: tpu_custom_call.1
= control target key start
LH: loop header
LB: loop body
LE: loop exit
PB: predicated region body
PF: predicated region fallthrough
CT: control target
= control target key end

     0   :  { %14 = vsyncpa [#allocation3], 0  ;;  %s904_s0 = inlined_call_operand.vmem [shape: f32[32,32], index: 0, kind: input, shape index: {}]   ;;  %s905_s1 = inlined_call_operand.hbm [shape: f32[16,32], index: 1, kind: input, shape index: {}]   ;;  %s906_s2 = inlined_call_operand.hbm [shape: f32[16,32], index: 2, kind: input, shape index: {}]   ;;  %s907_s3 = inlined_call_operand.vmem [shape: f32[1,32], index: 3, kind: input, shape index: {}]   ;;  %s908_s4 = inlined_call_operand.vmem [shape: f32[1,32], index: 4, kind: input, shape index: {}]   ;;  %s909_s5 = inlined_call_operand.hbm [shape: f32[32,32], index: 5, kind: input, shape index: {}]   ;;  %s910_s6 = inlined_call_operand.vmem [shape: f32[32,2], index: 6, kind: input, shape index: {}]   ;;  %s911_s7 = inlined_call_operand.vmem [shape: f32[32,2], index: 7, kind: output, shape index: {0}]   ;;  %s912_s8 = inlined_call_operand.hbm [shape: f32[1,1], index: 8, kind: output, shape index: {1}]  }
   0x1   :  { %15 = vsyncpa [#allocation6], 0 }
   0x2   :  { %16 = vsyncpa [#allocation4], 0  ;;  %s707_s27 = smov [#allocation5]   ;;  %s708_s29 = smov [#allocation2]  }
   0x3   :  { %s36_s28 = sshll.u32 %s707_s27, 4  ;;  %s24_s30 = sshll.u32 %s708_s29, 4  ;;  %s37_s28 = int_to_ptr.vmem [resolvable:$true] %s36_s28  ;;  %s758_s30 = int_to_ptr.vmem [resolvable:$true] %s24_s30 }
   0x4   :  { %s625_s11 = scalar_lea.hbm %s906_s2, 256 }
   0x5   :  { %p626_p0 = scmp.ne.s32.totalorder %s906_s2, %s625_s11  ;;  %p629_p1 = scmp.lt.u32.totalorder %s625_s11, %s906_s2 }
   0x7   :  { %p631_p2 = pnand %p629_p1, %p626_p0 }
   0x9   :  { %634 = shalt.err (!%p631_p2)
}
   0xa   :  { %s635_s16 = scalar_lea.vmem %s37_s28, 256  ;;  %p640_p4 = scmp.lt.s32.totalorder %s37_s28, %s37_s28 }
   0xb   :  { %p636_p3 = scmp.ne.s32.totalorder %s37_s28, %s635_s16  ;;  %p641_p5 = scmp.lt.s32.totalorder %s635_s16, %s635_s16 }
   0xd   :  { %p642_p6 = por %p641_p5, %p640_p4 }
   0xf   :  { %p643_p7 = pnand %p642_p6, %p636_p3 }
  0x11   :  { %646 = shalt.err (!%p643_p7)
}
  0x12   :  { %s709_s17 = smov 128   ;;  %s710_s18 = smov 8  }
  0x13   :  { %42 = dma.hbm_to_vmem [thread:$0]  %s906_s2, 256, %s37_s28, [#allocation6], %s709_s17, %s709_s17, %s710_s18  }
  0x14   :  { %s647_s23 = scalar_lea.hbm %s905_s1, 256 }
  0x15   :  { %p648_p8 = scmp.ne.s32.totalorder %s905_s1, %s647_s23  ;;  %p651_p9 = scmp.lt.u32.totalorder %s647_s23, %s905_s1 }
  0x17   :  { %p653_p10 = pnand %p651_p9, %p648_p8 }
  0x19   :  { %656 = shalt.err (!%p653_p10)
}
  0x1a   :  { %s657_s29 = scalar_lea.vmem %s758_s30, 256  ;;  %p662_p12 = scmp.lt.s32.totalorder %s758_s30, %s758_s30 }
  0x1b   :  { %p658_p11 = scmp.ne.s32.totalorder %s758_s30, %s657_s29  ;;  %p663_p13 = scmp.lt.s32.totalorder %s657_s29, %s657_s29 }
  0x1d   :  { %p664_p0 = por %p663_p13, %p662_p12 }
  0x1f   :  { %p665_p1 = pnand %p664_p0, %p658_p11 }
  0x21   :  { %668 = shalt.err (!%p665_p1)
}
  0x22   :  { %30 = dma.hbm_to_vmem [thread:$0]  %s905_s1, 256, %s758_s30, [#allocation3], %s709_s17, %s709_s17, %s710_s18  }
  0x23   :  { %s711_s9 = smov [#allocation7]   ;;  %s669_s13 = scalar_lea.hbm %s909_s5, 512 }
  0x24   :  { %s52_s10 = sshll.u32 %s711_s9, 4  ;;  %p670_p2 = scmp.ne.s32.totalorder %s909_s5, %s669_s13  ;;  %s53_s10 = int_to_ptr.vmem [resolvable:$true] %s52_s10 }
  0x25   :  { %p673_p3 = scmp.lt.u32.totalorder %s669_s13, %s909_s5 }
  0x27   :  { %p675_p4 = pnand %p673_p3, %p670_p2 }
  0x29   :  { %678 = shalt.err (!%p675_p4)
}
  0x2a   :  { %s679_s20 = scalar_lea.vmem %s53_s10, 512  ;;  %p684_p6 = scmp.lt.s32.totalorder %s53_s10, %s53_s10 }
  0x2b   :  { %p680_p5 = scmp.ne.s32.totalorder %s53_s10, %s679_s20  ;;  %p685_p7 = scmp.lt.s32.totalorder %s679_s20, %s679_s20 }
  0x2d   :  { %p686_p8 = por %p685_p7, %p684_p6 }
  0x2f   :  { %p687_p9 = pnand %p686_p8, %p680_p5 }
  0x31   :  { %690 = shalt.err (!%p687_p9)
}
  0x32   :  { %58 = dma.hbm_to_vmem [thread:$0]  %s909_s5, 512, %s53_s10, [#allocation6], %s709_s17, %s709_s17, %s710_s18  }
  0x33   :  { %701 = dma.done.wait [#allocation3], 256  }
  0x34   :  { %702 = vsyncadd [#allocation3], 4294967040 }
  0x35   :  { %703 = dma.done.wait [#allocation6], 768  }
  0x36   :  { %704 = vsyncadd [#allocation6], 4294966528  ;;  %v73_v0 = vld [vmem:[%s904_s0 + $0x10] sm:$0xff]  ;;  %vm83_vm0 = vcmask 261120   ;;  %v71_v1 = vld [vmem:[%s904_s0] sm:$0xff]  ;;  %vm184_vm1 = vcmask 130048  }
  0x37   :  { %v74_v2 = vld [vmem:[%s904_s0 + $0x18] sm:$0xff]  ;;  %v81_v3 = vmul.f32 %v73_v0, %v73_v0  ;;  %v79_v4 = vmul.f32 %v71_v1, %v71_v1  ;;  %v72_v6 = vld [vmem:[%s904_s0 + $0x8] sm:$0xff]  ;;  %v75_v7 = vld [vmem:[#allocation2] sm:$0xff]  ;;  %vm495_vm2 = vcmask 122880   ;;  %s691_s16 = scalar_lea.hbm %s912_s8, 16 }
  0x38   :  { %v82_v5 = vmul.f32 %v74_v2, %v74_v2  ;;  %v76_v8 = vld [vmem:[#allocation2 + $0x8] sm:$0xff]  ;;  %v80_v9 = vmul.f32 %v72_v6, %v72_v6  ;;  %v108_v10 = vmul.f32 %v75_v7, %v75_v7  ;;  %p692_p10 = scmp.ne.s32.totalorder %s912_s8, %s691_s16  ;;  %p695_p11 = scmp.lt.u32.totalorder %s691_s16, %s912_s8 }
  0x39   :  { %v109_v11 = vmul.f32 %v76_v8, %v76_v8  ;;  %v90_v12 = vsel %vm83_vm0, %v81_v3, 0.0  ;;  %v84_v13 = vsel %vm83_vm0, %v79_v4, 0.0 }
  0x3a   :  { %91 = vadd.xlane.f32.xlu1 %v90_v12  ;;  %85 = vadd.xlane.f32.xlu0 %v84_v13  ;;  %v110_v14 = vsel %vm83_vm0, %v108_v10, 0.0  ;;  %v93_v16 = vsel %vm83_vm0, %v82_v5, 0.0  ;;  %v87_v17 = vsel %vm83_vm0, %v80_v9, 0.0  ;;  %v77_v13 = vld [vmem:[#allocation5] sm:$0xff]  ;;  %p697_p12 = pnand %p695_p11, %p692_p10 }
  0x3b   :  { %v111_v15 = vsel %vm83_vm0, %v109_v11, 0.0 }
  0x3c   :  { %v112_v18 = vadd.f32 %v111_v15, %v110_v14  ;;  %v78_v14 = vld [vmem:[#allocation5 + $0x8] sm:$0xff] }
  0x3d   :  { %v231_v15 = vpack.c.bf16 %v78_v14, %v77_v13 }
  0x3e   :  { %v113_v19 = vrot.slane %v112_v18, 4  ;;  %94 = vadd.xlane.f32.xlu1 %v93_v16  ;;  %88 = vadd.xlane.f32.xlu0 %v87_v17 }
  0x3f   :  { %560 = vmatprep.subr.bf16.mxu1 %v231_v15 }
  0x40   :  { %v114_v20 = vadd.f32 %v113_v19, %v112_v18  ;;  %561 = vmatpush3.bf16.msra.mxu1 %v231_v15 }
  0x42   :  { %v115_v21 = vrot.slane %v114_v20, 2 }
  0x44   :  { %v116_v22 = vadd.f32 %v115_v21, %v114_v20 }
  0x46   :  { %v117_v23 = vrot.slane %v116_v22, 1 }
  0x48   :  { %v118_v24 = vadd.f32 %v117_v23, %v116_v22 }
  0x4a   :  { %v119_v25 = vmax.f32 %v118_v24, 1e-24 }
  0x4c   :  { %597 = vrsqrt.f32 %v119_v25 }
  0x56   :  { %v598_v26 = vpop.eup %597 }
  0x57   :  { %v121_v27 = vmul.f32 %v598_v26, %v75_v7  ;;  %v122_v28 = vmul.f32 %v598_v26, %v76_v8 }
  0x59   :  { %v125_v29 = vpack.c.bf16 %v122_v28, %v121_v27 }
  0x5b   :  { %588 = vmatprep.subr.msk.bf16.mxu0 %vm83_vm0, %v125_v29  ;;  %v133_v30 = vsel %vm83_vm0, %v125_v29, 0 }
  0x5c   :  { %555 = vmatpush3.bf16.xpose.msra.mxu0 %v133_v30 }
  0xc7   :  { %v92_v31 = vpop.xlane.xlu1 %91  ;;  %v86_v32 = vpop.xlane.xlu0 %85 }
  0xc8   :  { %v98_v33 = vmax.f32 %v92_v31, 1e-24  ;;  %v96_v34 = vmax.f32 %v86_v32, 1e-24 }
  0xca   :  { %599 = vrsqrt.f32 %v98_v33 }
  0xcb   :  { %v95_v35 = vpop.xlane.xlu1 %94  ;;  %v89_v36 = vpop.xlane.xlu0 %88  ;;  %601 = vrsqrt.f32 %v96_v34 }
  0xcc   :  { %v99_v37 = vmax.f32 %v95_v35, 1e-24  ;;  %v97_v38 = vmax.f32 %v89_v36, 1e-24 }
  0xce   :  { %603 = vrsqrt.f32 %v99_v37 }
  0xcf   :  { %605 = vrsqrt.f32 %v97_v38 }
  0xd4   :  { %v600_v39 = vpop.eup %599 }
  0xd5   :  { %v602_v40 = vpop.eup %601  ;;  %v106_v43 = vmul.f32 %v600_v39, %v73_v0 }
  0xd6   :  { %v104_v45 = vmul.f32 %v602_v40, %v71_v1 }
  0xd8   :  { %v604_v41 = vpop.eup %603 }
  0xd9   :  { %v606_v42 = vpop.eup %605  ;;  %v107_v44 = vmul.f32 %v604_v41, %v74_v2 }
  0xda   :  { %v105_v46 = vmul.f32 %v606_v42, %v72_v6 }
  0xdb   :  { %v124_v47 = vpack.c.bf16 %v107_v44, %v106_v43 }
  0xdc   :  { %v123_v48 = vpack.c.bf16 %v105_v46, %v104_v45 }
  0xde   :  { %556 = vmatprep.mubr.msk.bf16.mxu0 %vm83_vm0, %v123_v48 }
  0xdf   :  { %557 = vmatmul.mubr.msk.bf16.vlgmr.msra.gmra.mrb[0].mxu0 %vm83_vm0, %v124_v47 }
 0x1b2   :  { %v558_v49 = vpop.f32.mrb[0].mxu0 }
 0x1b3   :  { %v169_v50 = vpop.f32.mrb[1].mxu0  ;;  %v191_v55 = vsel %vm184_vm1, %v558_v49, -inf }
 0x1b4   :  { %v559_v51 = vpop.f32.mrb[2].mxu0  ;;  %v185_v52 = vsel %vm184_vm1, %v169_v50, -inf }
 0x1b5   :  { %186 = vmax.xlane.f32.xlu0 %v185_v52  ;;  %v172_v53 = vpop.f32.mrb[3].mxu0  ;;  %v194_v56 = vsel %vm184_vm1, %v559_v51, -inf }
 0x1b6   :  { %v188_v54 = vsel %vm184_vm1, %v172_v53, -inf }
 0x1b7   :  { %189 = vmax.xlane.f32.xlu1 %v188_v54 }
 0x1b9   :  { %192 = vmax.xlane.f32.xlu0 %v191_v55 }
 0x1bb   :  { %195 = vmax.xlane.f32.xlu1 %v194_v56 }
 0x242   :  { %v187_v57 = vpop.xlane.xlu0 %186 }
 0x243   :  { %v197_v58 = vsub.f32 %v169_v50, %v187_v57 }
 0x244   :  { %v190_v59 = vpop.xlane.xlu1 %189 }
 0x245   :  { %v201_v60 = vmul.f32 1.442695, %v197_v58  ;;  %v198_v61 = vsub.f32 %v172_v53, %v190_v59 }
 0x246   :  { %v193_v62 = vpop.xlane.xlu0 %192 }
 0x247   :  { %607 = vpow2.f32 %v201_v60  ;;  %v203_v63 = vmul.f32 1.442695, %v198_v61  ;;  %v199_v0 = vsub.f32 %v558_v49, %v193_v62  ;;  %v360_v60 = vld [vmem:[%s910_s6] sm:$0xff]  ;;  %v361_v61 = vld [vmem:[%s910_s6 + $0x8] sm:$0xff] }
 0x248   :  { %v196_v1 = vpop.xlane.xlu1 %195  ;;  %v580_v62 = vpack.c.bf16 %v361_v61, %v360_v60  ;;  %v353_v60 = vld [vmem:[#allocation7 + $0x8] sm:$0xff]  ;;  %v352_v61 = vld [vmem:[#allocation7] sm:$0xff] }
 0x249   :  { %609 = vpow2.f32 %v203_v63  ;;  %v205_v2 = vmul.f32 1.442695, %v199_v0  ;;  %v200_v3 = vsub.f32 %v559_v51, %v196_v1  ;;  %v362_v63 = vld [vmem:[%s910_s6 + $0x10] sm:$0xff]  ;;  %v363_v0 = vld [vmem:[%s910_s6 + $0x18] sm:$0xff] }
 0x24a   :  { %581 = vmatprep.subr.bf16.mxu1 %v580_v62  ;;  %v584_v1 = vpack.c.bf16 %v363_v0, %v362_v63 }
 0x24b   :  { %611 = vpow2.f32 %v205_v2  ;;  %v207_v4 = vmul.f32 1.442695, %v200_v3 }
 0x24d   :  { %613 = vpow2.f32 %v207_v4 }
 0x251   :  { %v608_v5 = vpop.eup %607 }
 0x252   :  { %v209_v6 = vsel %vm184_vm1, %v608_v5, 0.0 }
 0x253   :  { %v610_v7 = vpop.eup %609  ;;  %210 = vadd.xlane.f32.xlu0 %v209_v6 }
 0x254   :  { %v212_v8 = vsel %vm184_vm1, %v610_v7, 0.0 }
 0x255   :  { %v612_v9 = vpop.eup %611  ;;  %213 = vadd.xlane.f32.xlu1 %v212_v8 }
 0x256   :  { %v215_v10 = vsel %vm184_vm1, %v612_v9, 0.0 }
 0x257   :  { %v614_v11 = vpop.eup %613  ;;  %216 = vadd.xlane.f32.xlu0 %v215_v10 }
 0x258   :  { %v218_v12 = vsel %vm184_vm1, %v614_v11, 0.0 }
 0x259   :  { %219 = vadd.xlane.f32.xlu1 %v218_v12 }
 0x2e0   :  { %v211_v16 = vpop.xlane.xlu0 %210 }
 0x2e1   :  { %615 = vrcp.f32 %v211_v16 }
 0x2e2   :  { %v214_v17 = vpop.xlane.xlu1 %213 }
 0x2e3   :  { %617 = vrcp.f32 %v214_v17 }
 0x2e4   :  { %v217_v18 = vpop.xlane.xlu0 %216 }
 0x2e5   :  { %619 = vrcp.f32 %v217_v18 }
 0x2e6   :  { %v220_v19 = vpop.xlane.xlu1 %219 }
 0x2e7   :  { %621 = vrcp.f32 %v220_v19 }
 0x2eb   :  { %v616_v20 = vpop.eup %615 }
 0x2ec   :  { %v225_v22 = vmul.f32 %v616_v20, %v608_v5 }
 0x2ed   :  { %v618_v21 = vpop.eup %617 }
 0x2ee   :  { %v226_v23 = vmul.f32 %v618_v21, %v610_v7  ;;  %v466_v31 = vsel %vm184_vm1, %v225_v22, inf  ;;  %v479_v32 = vsel %vm184_vm1, %v225_v22, -inf }
 0x2ef   :  { %v620_v24 = vpop.eup %619 }
 0x2f0   :  { %v227_v25 = vmul.f32 %v620_v24, %v612_v9  ;;  %v229_v26 = vpack.c.bf16 %v226_v23, %v225_v22  ;;  %v467_v29 = vsel %vm184_vm1, %v226_v23, inf  ;;  %v480_v30 = vsel %vm184_vm1, %v226_v23, -inf }
 0x2f1   :  { %v622_v27 = vpop.eup %621  ;;  %v470_v38 = vmin.f32 %v466_v31, %v467_v29  ;;  %v483_v39 = vmax.f32 %v479_v32, %v480_v30 }
 0x2f2   :  { %v228_v28 = vmul.f32 %v622_v27, %v614_v11  ;;  %562 = vmatprep.mubr.msk.bf16.mxu1 %vm184_vm1, %v229_v26  ;;  %v468_v33 = vsel %vm184_vm1, %v227_v25, inf  ;;  %v481_v36 = vsel %vm184_vm1, %v227_v25, -inf }
 0x2f4   :  { %v230_v34 = vpack.c.bf16 %v228_v28, %v227_v25  ;;  %v469_v35 = vsel %vm184_vm1, %v228_v28, inf  ;;  %v482_v37 = vsel %vm184_vm1, %v228_v28, -inf }
 0x2f5   :  { %v471_v40 = vmin.f32 %v468_v33, %v469_v35  ;;  %v484_v41 = vmax.f32 %v481_v36, %v482_v37 }
 0x2f6   :  { %563 = vmatmul.mubr.msk.bf16.vlgmr.msra.gmra.mrb[0].mxu1 %vm184_vm1, %v230_v34 }
 0x2f7   :  { %v472_v42 = vmin.f32 %v470_v38, %v471_v40  ;;  %v485_v43 = vmax.f32 %v483_v39, %v484_v41  ;;  %583 = vmatpush3.bf16.msra.mxu1 %v580_v62 }
 0x2f8   :  { %585 = vmatprep.subr.bf16.mxu1 %v584_v1 }
 0x2f9   :  { %v473_v44 = vrot.slane %v472_v42, 4  ;;  %v486_v45 = vrot.slane %v485_v43, 4 }
 0x2fb   :  { %v474_v46 = vmin.f32 %v472_v42, %v473_v44  ;;  %v487_v47 = vmax.f32 %v485_v43, %v486_v45  ;;  %587 = vmatpush3.bf16.msra.mxu1 %v584_v1 }
 0x2fd   :  { %v475_v48 = vrot.slane %v474_v46, 2  ;;  %v488_v49 = vrot.slane %v487_v47, 2 }
 0x2ff   :  { %v476_v50 = vmin.f32 %v474_v46, %v475_v48  ;;  %v489_v51 = vmax.f32 %v487_v47, %v488_v49 }
 0x301   :  { %v477_v52 = vrot.slane %v476_v50, 1  ;;  %v490_v53 = vrot.slane %v489_v51, 1 }
 0x303   :  { %v478_v54 = vmin.f32 %v476_v50, %v477_v52  ;;  %v491_v55 = vmax.f32 %v489_v51, %v490_v53  ;;  %v534_v51 = vld [vmem:[%s907_s3] ss:$0 sm:$0xff] }
 0x305   :  { %v492_v56 = vsub.f32 %v478_v54, %v491_v55 }
 0x307   :  { %v493_v57 = vadd.f32 0.3, %v492_v56  ;;  %v535_v56 = vld [vmem:[%s908_s4] ss:$0 sm:$0xff] }
 0x309   :  { %v494_v58 = vmax.f32 %v493_v57, 0.0 }
 0x30b   :  { %v496_v59 = vsel %vm495_vm2, %v494_v58, 0.0 }
 0x30c   :  { %497 = vadd.xlane.f32.xlu0 %v496_v59 }
 0x399   :  { %v498_v2 = vpop.xlane.xlu0 %497 }
 0x39a   :  { %v499_v3 = vrot.slane %v498_v2, 4 }
 0x39c   :  { %v500_v4 = vadd.f32 %v499_v3, %v498_v2  ;;  %v354_v2 = vld [vmem:[#allocation7 + $0x10] sm:$0xff] }
 0x39e   :  { %v501_v5 = vrot.slane %v500_v4, 2 }
 0x3a0   :  { %v502_v6 = vadd.f32 %v501_v5, %v500_v4 }
 0x3a2   :  { %v503_v7 = vrot.slane %v502_v6, 1 }
 0x3a4   :  { %v504_v8 = vadd.f32 %v503_v7, %v502_v6  ;;  %v355_v7 = vld [vmem:[#allocation7 + $0x18] sm:$0xff] }
 0x3a6   :  { %589 = vpush %v504_v8 }
 0x3c9   :  { %v564_v9 = vpop.f32.mrb[0].mxu1 }
 0x3ca   :  { %v272_v10 = vpop.f32.mrb[1].mxu1  ;;  %v290_v16 = vsel %vm83_vm0, %v564_v9, 0.0 }
 0x3cb   :  { %v565_v11 = vpop.f32.mrb[2].mxu1  ;;  %v287_v13 = vsel %vm83_vm0, %v272_v10, 0.0 }
 0x3cc   :  { %v275_v12 = vpop.f32.mrb[3].mxu1  ;;  %v292_v18 = vsel %vm83_vm0, %v565_v11, 0.0 }
 0x3cd   :  { %v288_v14 = vsel %vm83_vm0, %v275_v12, 0.0 }
 0x3ce   :  { %v289_v15 = vadd.f32 %v288_v14, %v287_v13 }
 0x3d0   :  { %v291_v17 = vadd.f32 %v290_v16, %v289_v15 }
 0x3d2   :  { %v293_v19 = vadd.f32 %v292_v18, %v291_v17 }
 0x3d4   :  { %v294_v20 = vrot.slane %v293_v19, 4 }
 0x3d6   :  { %v295_v21 = vadd.f32 %v294_v20, %v293_v19 }
 0x3d7   :  { %s590_s6 = spop %589 }
 0x3d8   :  { %v296_v22 = vrot.slane %v295_v21, 2  ;;  %s508_s11 = smul.f32 0.0625, %s590_s6 }
 0x3da   :  { %v297_v23 = vadd.f32 %v296_v22, %v295_v21  ;;  %510 = sst [smem:[#allocation8]] %s508_s11 }
 0x3dc   :  { %v298_v24 = vrot.slane %v297_v23, 1 }
 0x3de   :  { %v299_v25 = vadd.f32 %v298_v24, %v297_v23 }
 0x3e0   :  { %v301_v26 = vmul.f32 0.03125, %v299_v25 }
 0x3e2   :  { %v302_v27 = vsub.f32 %v272_v10, %v301_v26  ;;  %v303_v28 = vsub.f32 %v275_v12, %v301_v26  ;;  %v304_v29 = vsub.f32 %v564_v9, %v301_v26  ;;  %v305_v30 = vsub.f32 %v565_v11, %v301_v26 }
 0x3e4   :  { %v306_v31 = vmul.f32 %v302_v27, %v302_v27  ;;  %v307_v32 = vmul.f32 %v303_v28, %v303_v28  ;;  %v308_v33 = vmul.f32 %v304_v29, %v304_v29  ;;  %v309_v34 = vmul.f32 %v305_v30, %v305_v30 }
 0x3e6   :  { %v310_v35 = vsel %vm83_vm0, %v306_v31, 0.0  ;;  %v311_v36 = vsel %vm83_vm0, %v307_v32, 0.0  ;;  %v313_v38 = vsel %vm83_vm0, %v308_v33, 0.0  ;;  %v315_v40 = vsel %vm83_vm0, %v309_v34, 0.0 }
 0x3e7   :  { %v312_v37 = vadd.f32 %v311_v36, %v310_v35 }
 0x3e9   :  { %v314_v39 = vadd.f32 %v313_v38, %v312_v37 }
 0x3eb   :  { %v316_v41 = vadd.f32 %v315_v40, %v314_v39 }
 0x3ed   :  { %v317_v42 = vrot.slane %v316_v41, 4 }
 0x3ef   :  { %v318_v43 = vadd.f32 %v317_v42, %v316_v41 }
 0x3f1   :  { %v319_v44 = vrot.slane %v318_v43, 2 }
 0x3f3   :  { %v320_v45 = vadd.f32 %v319_v44, %v318_v43 }
 0x3f5   :  { %v321_v46 = vrot.slane %v320_v45, 1 }
 0x3f7   :  { %v322_v47 = vadd.f32 %v321_v46, %v320_v45 }
 0x3f9   :  { %v323_v48 = vmul.f32 0.03125, %v322_v47 }
 0x3fb   :  { %v324_v49 = vadd.f32 1e-05, %v323_v48 }
 0x3fd   :  { %623 = vrsqrt.f32 %v324_v49 }
 0x407   :  { %v624_v50 = vpop.eup %623 }
 0x408   :  { %v327_v52 = vmul.f32 %v624_v50, %v303_v28  ;;  %v326_v53 = vmul.f32 %v624_v50, %v302_v27  ;;  %v328_v54 = vmul.f32 %v624_v50, %v304_v29  ;;  %v329_v55 = vmul.f32 %v624_v50, %v305_v30 }
 0x40a   :  { %v338_v57 = vmul.f32 %v534_v51, %v327_v52  ;;  %v337_v58 = vmul.f32 %v534_v51, %v326_v53  ;;  %v339_v59 = vmul.f32 %v534_v51, %v328_v54  ;;  %v340_v62 = vmul.f32 %v534_v51, %v329_v55 }
 0x40c   :  { %v349_v63 = vadd.f32 %v535_v56, %v338_v57  ;;  %v348_v0 = vadd.f32 %v535_v56, %v337_v58  ;;  %v350_v1 = vadd.f32 %v535_v56, %v339_v59  ;;  %v351_v5 = vadd.f32 %v535_v56, %v340_v62 }
 0x40e   :  { %v357_v3 = vsub.f32 %v353_v60, %v349_v63  ;;  %v356_v4 = vsub.f32 %v352_v61, %v348_v0  ;;  %v358_v6 = vsub.f32 %v354_v2, %v350_v1  ;;  %v359_v8 = vsub.f32 %v355_v7, %v351_v5 }
 0x410   :  { %574 = vmatprep.mubr.msk.f32.mxu1 %vm83_vm0, %v356_v4 }
 0x411   :  { %575 = vmatmul.mubr.msk.f32.vlgmr.msra.gmra.mrb[4].mxu1 %vm83_vm0, %v357_v3 }
 0x412   :  { %577 = vmatprep.mubr.msk.f32.mxu1 %vm83_vm0, %v358_v6 }
 0x415   :  { %578 = vmatmul.mubr.msk.f32.gmra.mrb[6].mxu1 %vm83_vm0, %v359_v8 }
 0x416   :  { %700 = shalt.err (!%p697_p12)
}
 0x417   :  { %s712_s21 = smov [#allocation8]   ;;  %vm461_vm3 = vcmask 15360  }
 0x418   :  { %520 = dma.smem_to_hbm %s712_s21, 16, %s912_s8, [#allocation4]  }
 0x4e4   :  { %v576_v9 = vpop.f32.mrb[4].mxu1 }
 0x4e5   :  { %463 = vst.msk [vmem:[%s911_s7 + $0x8] sm:$0xff] %vm461_vm3, %v576_v9  ;;  %v442_v10 = vpop.f32.mrb[5].mxu1 }
 0x4e6   :  { %462 = vst.msk [vmem:[%s911_s7] sm:$0xff] %vm461_vm3, %v442_v10 }
 0x4e8   :  { %v579_v11 = vpop.f32.mrb[6].mxu1 }
 0x4e9   :  { %465 = vst.msk [vmem:[%s911_s7 + $0x18] sm:$0xff] %vm461_vm3, %v579_v11  ;;  %v452_v12 = vpop.f32.mrb[7].mxu1 }
 0x4ea   :  { %464 = vst.msk [vmem:[%s911_s7 + $0x10] sm:$0xff] %vm461_vm3, %v452_v12 }
 0x4eb   :  { %705 = dma.done.wait [#allocation4], 16  }
 0x4ec   :  { %706 = vsyncadd [#allocation4], 4294967280 }
 0x4ed   :  { %526 = sfence }
 0x4ee   :  { %527 = vsyncpa [#allocation3], 1 }
 0x4ef   :  { %528 = vsyncpa [#allocation6], 1 }
 0x4f0   :  { %529 = vsyncpa [#allocation4], 1 }

</bundles_post_ra>
